<compile_context>
chip_gen: v7x
topology: tpu7x:2x2x1
jax: 0.10.0
libtpu: 0.0.40
codegen_flags: <defaults>
</compile_context>

<pallas_src>
import jax
import jax.numpy as jnp
from jax.experimental import pallas as pl
from jax.experimental.pallas import tpu as pltpu


def dense_attn_kernel(sl_ref, sr_ref, adj_ref, out_ref):
    # sl_ref:  (tm, 1)  f32  = w_l . x[i] + b   (per-row score, bias folded in)
    # sr_ref:  (1, tn)  f32  = w_r . x[j]       (per-col score, pre-transposed)
    # adj_ref: (tm, tn) int8 dense adjacency counts
    # out_ref: (tm, tn) out_dtype
    score = sl_ref[...] + sr_ref[...]                     # VPU broadcast add
    attn = jax.nn.sigmoid(score)                          # EUP
    out_ref[...] = (adj_ref[...].astype(jnp.float32) * attn).astype(out_ref.dtype)


def dense_attn(x, edge_index, weight, bias, *, tile_m=1024, tile_n=1024,
               out_dtype=jnp.float32):
    """x: (N, D) float, edge_index: (2, E) int32, weight: (1, 2D), bias: (1,).

    Pass out_dtype=jnp.bfloat16 to halve the output HBM write if the consumer
    tolerates it (compute stays f32; only the store is cast).
    """
    assert tile_m % 32 == 0 and tile_n % 128 == 0
    n, d = x.shape
    x = x.astype(jnp.float32)

    # Split Linear(2D -> 1) into left/right halves; hoist the matvecs (MXU work
    # this small is wasted inside a mem-bound tile loop) and fold the bias.
    w_l = weight[0, :d].astype(jnp.float32)
    w_r = weight[0, d:].astype(jnp.float32)
    b = bias.astype(jnp.float32)[0]
    s_l = (x @ w_l + b).reshape(n, 1)                     # (N, 1)
    s_r = (x @ w_r).reshape(1, n)                         # (1, N) already row-shaped

    # Dense adjacency built directly in int8 at the *unpadded* (N, N) size.
    # Duplicate edges sum (matches to_dense_adj); 1 B/elem kernel-side read.
    # TODO(synk): int8 counts wrap if any (i, j) pair has >127 duplicate edges.
    src, dst = edge_index[0], edge_index[1]
    adj = jnp.zeros((n, n), jnp.int8).at[src, dst].add(jnp.int8(1))

    # Effective tiles: cap at N so small arrays use a single full-extent block
    # (exempt from the (8,128) divisibility rule).  For N > tile the last block
    # along each axis is ragged; Pallas masks the boundary stores.
    tm = min(tile_m, n)
    tn = min(tile_n, n)
    grid = (pl.cdiv(n, tm), pl.cdiv(n, tn))

    out = pl.pallas_call(
        dense_attn_kernel,
        out_shape=jax.ShapeDtypeStruct((n, n), out_dtype),
        grid_spec=pltpu.PrefetchScalarGridSpec(
            num_scalar_prefetch=0,
            grid=grid,
            in_specs=[
                pl.BlockSpec((tm, 1), lambda i, j: (i, 0)),    # s_l (per-row)
                pl.BlockSpec((1, tn), lambda i, j: (0, j)),    # s_r (per-col)
                pl.BlockSpec((tm, tn), lambda i, j: (i, j)),   # adj (int8)
            ],
            out_specs=pl.BlockSpec((tm, tn), lambda i, j: (i, j)),
        ),
        compiler_params=pltpu.CompilerParams(
            dimension_semantics=("parallel", "parallel"),      # shard grid across TCs
        ),
    )(s_l, s_r, adj)
    return out                                            # (N, N), no slice copy


def dense_attn_ref(x, edge_index, weight, bias):
    """Pure-JAX reference mirroring the PyTorch forward (cat + Linear)."""
    n, d = x.shape
    src, dst = edge_index[0], edge_index[1]
    adj = jnp.zeros((n, n), jnp.float32).at[src, dst].add(1.0)
    x = x.astype(jnp.float32)
    x_l = jnp.broadcast_to(x[:, None, :], (n, n, d))
    x_r = jnp.broadcast_to(x[None, :, :], (n, n, d))
    x_cat = jnp.concatenate([x_l, x_r], axis=2)                # (N, N, 2D)
    score = (x_cat @ weight.astype(jnp.float32).T).squeeze(-1) + bias.astype(jnp.float32)[0]
    return adj * jax.nn.sigmoid(score)


if __name__ == "__main__":
    key = jax.random.PRNGKey(0)
    k_x, k_w, k_b, k_e, k_x2, k_e2, k_x3, k_e3 = jax.random.split(key, 8)

    in_dim = 32
    weight = jax.random.normal(k_w, (1, 2 * in_dim), jnp.float32) * 0.1
    bias = jax.random.normal(k_b, (1,), jnp.float32) * 0.1

    # --- small case (single full-extent block) ---
    n = 8
    x = jax.random.normal(k_x, (n, in_dim), jnp.float32)
    edge_index = jax.random.randint(k_e, (2, 20), 0, n, jnp.int32)
    out = dense_attn(x, edge_index, weight, bias)
    jax.block_until_ready(out)
    ref = dense_attn_ref(x, edge_index, weight, bias)
    assert out.shape == (n, n)
    assert jnp.allclose(out, ref, atol=1e-5, rtol=1e-5)

    # --- ragged multi-tile case (N not a multiple of the block) ---
    n2 = 200
    x2 = jax.random.normal(k_x2, (n2, in_dim), jnp.float32)
    edge_index2 = jax.random.randint(k_e2, (2, 400), 0, n2, jnp.int32)
    out2 = dense_attn(x2, edge_index2, weight, bias, tile_m=64, tile_n=128)
    jax.block_until_ready(out2)
    ref2 = dense_attn_ref(x2, edge_index2, weight, bias)
    assert out2.shape == (n2, n2)
    assert jnp.allclose(out2, ref2, atol=1e-5, rtol=1e-5)

    # --- divisible multi-tile case (exercises the unmasked-store path) ---
    n3 = 256
    x3 = jax.random.normal(k_x3, (n3, in_dim), jnp.float32)
    edge_index3 = jax.random.randint(k_e3, (2, 512), 0, n3, jnp.int32)
    out3 = dense_attn(x3, edge_index3, weight, bias, tile_m=128, tile_n=128)
    jax.block_until_ready(out3)
    ref3 = dense_attn_ref(x3, edge_index3, weight, bias)
    assert out3.shape == (n3, n3)
    assert jnp.allclose(out3, ref3, atol=1e-5, rtol=1e-5)

    print("KERNEL_OK")
</pallas_src>

<mosaic_0001>
module attributes {stable_mosaic.version = 11 : i64} {
  func.func @dense_attn_kernel(%arg0: i32, %arg1: i32, %arg2: memref<8x1xf32, #tpu.memory_space<vmem>>, %arg3: memref<1x8xf32, #tpu.memory_space<vmem>>, %arg4: memref<8x8xi8, #tpu.memory_space<vmem>>, %arg5: memref<8x8xf32, #tpu.memory_space<vmem>>) attributes {dimension_semantics = [#tpu.dimension_semantics<parallel>, #tpu.dimension_semantics<parallel>], iteration_bounds = array<i64: 1, 1>, scalar_prefetch = 0 : i64, scratch_operands = 0 : i64, tpu.core_type = #tpu.core_type<tc>, window_params = [{transform_indices = @transform_0, window_bounds = array<i64: 8, 1>}, {transform_indices = @transform_1, window_bounds = array<i64: 1, 8>}, {transform_indices = @transform_2, window_bounds = array<i64: 8, 8>}, {transform_indices = @transform_3, window_bounds = array<i64: 8, 8>}]} {
    %c0 = arith.constant 0 : index
    %c0_0 = arith.constant 0 : index
    %0 = vector.load %arg2[%c0, %c0_0] : memref<8x1xf32, #tpu.memory_space<vmem>>, vector<8x1xf32>
    %c0_1 = arith.constant 0 : index
    %c0_2 = arith.constant 0 : index
    %1 = vector.load %arg3[%c0_1, %c0_2] : memref<1x8xf32, #tpu.memory_space<vmem>>, vector<1x8xf32>
    %2 = vector.broadcast %0 : vector<8x1xf32> to vector<8x8xf32>
    %3 = vector.broadcast %1 : vector<1x8xf32> to vector<8x8xf32>
    %4 = arith.addf %2, %3 : vector<8x8xf32>
    %5 = arith.negf %4 : vector<8x8xf32>
    %6 = math.exp %5 : vector<8x8xf32>
    %cst = arith.constant 1.000000e+00 : f32
    %7 = vector.broadcast %cst : f32 to vector<8x8xf32>
    %8 = arith.addf %7, %6 : vector<8x8xf32>
    %9 = arith.divf %7, %8 : vector<8x8xf32>
    %c0_3 = arith.constant 0 : index
    %c0_4 = arith.constant 0 : index
    %10 = vector.load %arg4[%c0_3, %c0_4] : memref<8x8xi8, #tpu.memory_space<vmem>>, vector<8x8xi8>
    %11 = arith.sitofp %10 : vector<8x8xi8> to vector<8x8xf32>
    %12 = arith.mulf %11, %9 : vector<8x8xf32>
    %c0_5 = arith.constant 0 : index
    %c0_6 = arith.constant 0 : index
    %13 = vector.load %arg5[%c0_5, %c0_6] : memref<8x8xf32, #tpu.memory_space<vmem>>, vector<8x8xf32>
    tpu.vector_store %arg5[%c0_5, %c0_6], %12 {strides = array<i32>} : memref<8x8xf32, #tpu.memory_space<vmem>>, vector<8x8xf32>,
    return
  }
  func.func @transform_0(%arg0: i32, %arg1: i32) -> (i32, i32) {
    %c0_i32 = arith.constant 0 : i32
    %c0_i32_0 = arith.constant 0 : i32
    return %arg0, %c0_i32 : i32, i32
  }
  func.func @transform_1(%arg0: i32, %arg1: i32) -> (i32, i32) {
    %c0_i32 = arith.constant 0 : i32
    %c0_i32_0 = arith.constant 0 : i32
    return %c0_i32, %arg1 : i32, i32
  }
  func.func @transform_2(%arg0: i32, %arg1: i32) -> (i32, i32) {
    %c0_i32 = arith.constant 0 : i32
    return %arg0, %arg1 : i32, i32
  }
  func.func @transform_3(%arg0: i32, %arg1: i32) -> (i32, i32) {
    %c0_i32 = arith.constant 0 : i32
    return %arg0, %arg1 : i32, i32
  }
}

</mosaic_0001>

<bundles_post_ra>
// kernel: tpu_custom_call.1
= control target key start
LH: loop header
LB: loop body
LE: loop exit
PB: predicated region body
PF: predicated region fallthrough
CT: control target
= control target key end

     0   :  { %s131_s0 = inlined_call_operand.vmem [shape: f32[8,1], index: 0, kind: input, shape index: {}]   ;;  %s132_s1 = inlined_call_operand.vmem [shape: f32[1,8], index: 1, kind: input, shape index: {}]   ;;  %s133_s2 = inlined_call_operand.vmem [shape: s8[8,8], index: 2, kind: input, shape index: {}]   ;;  %s134_s3 = inlined_call_operand.hbm [shape: f32[8,8], index: 3, kind: output, shape index: {}]  }
   0x1   :  { %v15_v0 = vld [vmem:[%s131_s0] sm:$0xff] }
   0x2   :  { %8 = vsyncpa [#allocation3], 0  ;;  %v88_v1 = vmov 0   ;;  %v55_v2 = vld [vmem:[%s132_s1] ss:$0 sm:$0xff]  ;;  %s89_s0 = smov [#allocation2]  }
   0x3   :  { %59 = vset.pattern.permute.xlu0 %v88_v1  ;;  %v35_v8 = vld [vmem:[%s133_s2] sm:$0x3]  ;;  %s47_s18 = sshll.u32 %s89_s0, 4  ;;  %vm39_vm0 = vcmask 64512   ;;  %s48_s18 = int_to_ptr.vmem [resolvable:$true] %s47_s18 }
   0x4   :  { %19 = vperm.xlu0 %59, %v15_v0   ;;  %v36_v9 = vunpack.c.0.s8 %v35_v8  ;;  %s64_s1 = scalar_lea.vmem %s48_s18, 128  ;;  %p69_p1 = scmp.lt.s32.totalorder %s48_s18, %s48_s18 }
   0x5   :  { %p65_p0 = scmp.ne.s32.totalorder %s48_s18, %s64_s1  ;;  %p70_p2 = scmp.lt.s32.totalorder %s64_s1, %s64_s1 }
   0x6   :  { %v37_v10 = vcvt.s32.f32 %v36_v9 }
   0x7   :  { %p71_p3 = por %p70_p2, %p69_p1 }
   0x9   :  { %p72_p4 = pnand %p71_p3, %p65_p0 }
  0x83   :  { %v20_v3 = vpop.permute.xlu0 %19 }
  0x84   :  { %v28_v4 = vadd.f32 %v55_v2, %v20_v3 }
  0x86   :  { %v56_v5 = vmul.f32 -1.442695, %v28_v4 }
  0x88   :  { %60 = vpow2.f32 %v56_v5 }
  0x92   :  { %v61_v6 = vpop.eup %60 }
  0x93   :  { %v32_v7 = vadd.f32 1.0, %v61_v6 }
  0x95   :  { %62 = vrcp.f32 %v32_v7 }
  0x9f   :  { %v63_v11 = vpop.eup %62 }
  0xa0   :  { %v38_v12 = vmul.f32 %v63_v11, %v37_v10 }
  0xa2   :  { %40 = vst.msk [vmem:[#allocation2] sm:$0xff] %vm39_vm0, %v38_v12 }
  0xa3   :  { %75 = shalt.err (!%p72_p4)
}
  0xa4   :  { %s76_s2 = scalar_lea.hbm %s134_s3, 128 }
  0xa5   :  { %p77_p5 = scmp.ne.s32.totalorder %s134_s3, %s76_s2  ;;  %p80_p6 = scmp.lt.u32.totalorder %s76_s2, %s134_s3 }
  0xa7   :  { %p82_p7 = pnand %p80_p6, %p77_p5 }
  0xa9   :  { %85 = shalt.err (!%p82_p7)
}
  0xaa   :  { %50 = dma.vmem_to_hbm [thread:$0]  %s48_s18, 128, %s134_s3, [#allocation3]  }
  0xab   :  { %86 = dma.done.wait [#allocation3], 128  }
  0xac   :  { %87 = vsyncadd [#allocation3], 4294967168 }
  0xad   :  { %54 = vsyncpa [#allocation3], 1 }

</bundles_post_ra>
